<compile_context>
chip_gen: v5e
topology: v5e:2x2
jax: 0.10.0
libtpu: 0.0.40
codegen_flags: <defaults>
</compile_context>

<pallas_src>
import functools
import math

import jax
import jax.numpy as jnp
import numpy as np
from jax import lax
from jax.experimental import pallas as pl
from jax.experimental.pallas import tpu as pltpu


def _pick_tile(dim, candidates=(512, 256, 128)):
    """Largest candidate tile that divides `dim`, else the full dim (single block)."""
    for c in candidates:
        if dim % c == 0:
            return c
    return dim


# ---------------- Kernel 1: fused QKV projection + SiLU (tiled matmul) ----------
def _matmul_silu_kernel(x_ref, w_ref, o_ref, acc_ref):
    @pl.when(pl.program_id(2) == 0)
    def _():
        acc_ref[...] = jnp.zeros_like(acc_ref)

    acc_ref[...] += jnp.dot(x_ref[...], w_ref[...],
                            preferred_element_type=jnp.float32)

    @pl.when(pl.program_id(2) == pl.num_programs(2) - 1)
    def _():
        y = acc_ref[...]
        o_ref[...] = (y * jax.nn.sigmoid(y)).astype(o_ref.dtype)


def qkv_proj_silu(x2d, w_t):
    M, K = x2d.shape
    N = w_t.shape[1]
    tm = _pick_tile(M, (256, 128))
    tn = _pick_tile(N, (512, 256, 128))
    tk = _pick_tile(K, (512, 256, 128))
    cost = pl.CostEstimate(
        flops=2 * M * K * N,
        transcendentals=M * N,
        bytes_accessed=4 * (M * K + K * N + M * N))
    return pl.pallas_call(
        _matmul_silu_kernel,
        grid=(M // tm, N // tn, K // tk),
        in_specs=[
            pl.BlockSpec((tm, tk), lambda i, j, kk: (i, kk)),
            pl.BlockSpec((tk, tn), lambda i, j, kk: (kk, j)),
        ],
        out_specs=pl.BlockSpec((tm, tn), lambda i, j, kk: (i, j)),
        out_shape=jax.ShapeDtypeStruct((M, N), x2d.dtype),
        scratch_shapes=[pltpu.VMEM((tm, tn), jnp.float32)],
        compiler_params=pltpu.CompilerParams(
            dimension_semantics=("parallel", "parallel", "arbitrary"),
            vmem_limit_bytes=64 * 1024 * 1024),
        cost_estimate=cost,
    )(x2d, w_t)


# ---------------- Kernel 2: block-parallel lightning-attention recurrence -------
def _lightning_block_kernel(bdec_ref,   # SMEM (h,)      exp(-s*B) per head
                            qkv_ref,    # (B, 3*h*d)     fused q/k/v activations
                            kv0_ref,    # (h, d, d) f32  initial kv state
                            diag_ref,   # (h, B, B) f32  intra-chunk decay mask
                            qdec_ref,   # (h, B, 1) f32  exp(-s*(t+1))
                            kdec_ref,   # (h, B, 1) f32  exp(-s*(B-1-t))
                            o_ref,      # (B, h*d)       attention output
                            kv_ref,     # (h, d, d) f32  kv state (resident over chunks)
                            *, num_heads, head_dim):
    ci = pl.program_id(1)

    @pl.when(ci == 0)
    def _():
        kv_ref[...] = kv0_ref[...]

    outs = []
    for hi in range(num_heads):
        base = 3 * head_dim * hi
        q = qkv_ref[:, pl.ds(base, head_dim)].astype(jnp.float32)              # (B, d)
        k = qkv_ref[:, pl.ds(base + head_dim, head_dim)].astype(jnp.float32)   # (B, d)
        v = qkv_ref[:, pl.ds(base + 2 * head_dim, head_dim)].astype(jnp.float32)
        kv = kv_ref[hi]                                                        # (d, d)

        # intra-chunk: (q @ k^T) masked by the causal decay matrix, times v
        qk = lax.dot_general(q, k, (((1,), (1,)), ((), ())),
                             preferred_element_type=jnp.float32)               # (B, B)
        intra = jnp.dot(qk * diag_ref[hi], v,
                        preferred_element_type=jnp.float32)                    # (B, d)
        # inter-chunk: decay-scaled q against the carried kv state
        inter = jnp.dot(q * qdec_ref[hi], kv,
                        preferred_element_type=jnp.float32)                    # (B, d)
        outs.append(intra + inter)

        # state update: kv <- exp(-s*B) * kv + (k * k_decay)^T @ v
        kv_ref[hi] = bdec_ref[hi] * kv + lax.dot_general(
            k * kdec_ref[hi], v, (((0,), (0,)), ((), ())),
            preferred_element_type=jnp.float32)

    # single lane-dense store of all heads
    o_ref[...] = jnp.concatenate(outs, axis=-1).astype(o_ref.dtype)


def lightning_recurrence_blocked(qkv, kv0, slope_rate, num_heads, head_dim,
                                 out_dtype, chunk_target=256):
    b, n, f3 = qkv.shape
    h, d = num_heads, head_dim
    assert f3 == 3 * h * d

    # chunk size: full sequence if short, else an MXU-sized block
    if n <= chunk_target:
        B = n
    else:
        B = _pick_tile(n, (chunk_target, 128, 64))
        if B == n:             # no convenient divisor -> pad the tail
            B = chunk_target
    n_pad = int(math.ceil(n / B) * B)
    pad = n_pad - n
    if pad:
        qkv = jnp.pad(qkv, ((0, 0), (0, pad), (0, 0)))
    nc = n_pad // B

    # per-head decay tensors, precomputed once (EUP work hoisted out of the kernel)
    s = slope_rate.reshape(h).astype(jnp.float32)
    pos = jnp.arange(B, dtype=jnp.float32)
    diff = pos[:, None] - pos[None, :]                                         # (B, B)
    diag_decay = jnp.exp(jnp.where(diff >= 0, -s[:, None, None] * diff, -jnp.inf))
    q_decay = jnp.exp(-s[:, None, None] * (pos + 1.0)[None, :, None])          # (h, B, 1)
    k_decay = jnp.exp(-s[:, None, None] * (B - 1.0 - pos)[None, :, None])      # (h, B, 1)
    block_decay = jnp.exp(-s * B)                                              # (h,)

    cost = pl.CostEstimate(
        flops=b * h * nc * (4 * B * B * d + 4 * B * d * d),
        transcendentals=0,
        bytes_accessed=4 * (b * n_pad * f3 + b * n_pad * h * d + 2 * b * h * d * d))

    attn, kv_new = pl.pallas_call(
        functools.partial(_lightning_block_kernel, num_heads=h, head_dim=d),
        grid=(b, nc),
        in_specs=[
            pl.BlockSpec(memory_space=pltpu.MemorySpace.SMEM),            # block_decay
            pl.BlockSpec((None, B, f3), lambda bi, ci: (bi, ci, 0)),       # qkv chunk
            pl.BlockSpec((None, h, d, d), lambda bi, ci: (bi, 0, 0, 0)),   # kv0
            pl.BlockSpec((h, B, B), lambda bi, ci: (0, 0, 0)),             # diag decay
            pl.BlockSpec((h, B, 1), lambda bi, ci: (0, 0, 0)),             # q decay
            pl.BlockSpec((h, B, 1), lambda bi, ci: (0, 0, 0)),             # k decay
        ],
        out_specs=[
            pl.BlockSpec((None, B, h * d), lambda bi, ci: (bi, ci, 0)),    # attn out
            pl.BlockSpec((None, h, d, d), lambda bi, ci: (bi, 0, 0, 0)),   # kv state
        ],
        out_shape=[
            jax.ShapeDtypeStruct((b, n_pad, h * d), out_dtype),
            jax.ShapeDtypeStruct((b, h, d, d), jnp.float32),
        ],
        compiler_params=pltpu.CompilerParams(
            dimension_semantics=("parallel", "arbitrary"),
            vmem_limit_bytes=64 * 1024 * 1024),
        cost_estimate=cost,
    )(block_decay, qkv, kv0.astype(jnp.float32), diag_decay, q_decay, k_decay)

    if pad:
        # zero-padded tail tokens contribute nothing but over-decay the state; undo it
        # TODO(synk): for very large slope*pad this correction can underflow in f32.
        kv_new = kv_new * jnp.exp(s * pad).reshape(1, h, 1, 1)
        attn = attn[:, :n, :]
    return attn, kv_new


# ---- Kernel 3: fused RMSNorm + sigmoid(output_gate(x)) * norm + out_proj -------
def _post_kernel(attn_ref, x_ref, nw_ref, wg_ref, wo_ref, o_ref, *, eps):
    a = attn_ref[...].astype(jnp.float32)                        # (tm, H)
    var = jnp.mean(a * a, axis=-1, keepdims=True)
    normed = nw_ref[...].astype(jnp.float32) * (a * lax.rsqrt(var + eps))
    gate = jax.nn.sigmoid(jnp.dot(x_ref[...].astype(jnp.float32), wg_ref[...],
                                  preferred_element_type=jnp.float32))
    y = (gate * normed).astype(wo_ref.dtype)
    o_ref[...] = jnp.dot(y, wo_ref[...],
                         preferred_element_type=jnp.float32).astype(o_ref.dtype)


def post_proj(attn_flat, x_flat, norm_w, wg_t, wo_t, eps=1e-6):
    M, H = attn_flat.shape
    D = x_flat.shape[1]
    out_dim = wo_t.shape[1]
    tm = _pick_tile(M, (256, 128))
    cost = pl.CostEstimate(
        flops=2 * M * D * H + 2 * M * H * out_dim,
        transcendentals=M * H,
        bytes_accessed=4 * (M * H + M * D + D * H + H * out_dim + M * out_dim))
    # TODO(synk): for very large hidden sizes the resident wg/wo weights should also
    # be tiled along their contraction axes.
    return pl.pallas_call(
        functools.partial(_post_kernel, eps=eps),
        grid=(M // tm,),
        in_specs=[
            pl.BlockSpec((tm, H), lambda i: (i, 0)),
            pl.BlockSpec((tm, D), lambda i: (i, 0)),
            pl.BlockSpec((1, H), lambda i: (0, 0)),
            pl.BlockSpec((D, H), lambda i: (0, 0)),
            pl.BlockSpec((H, out_dim), lambda i: (0, 0)),
        ],
        out_specs=pl.BlockSpec((tm, out_dim), lambda i: (i, 0)),
        out_shape=jax.ShapeDtypeStruct((M, out_dim), x_flat.dtype),
        compiler_params=pltpu.CompilerParams(
            dimension_semantics=("parallel",),
            vmem_limit_bytes=64 * 1024 * 1024),
        cost_estimate=cost,
    )(attn_flat, x_flat, norm_w, wg_t, wo_t)


# ------------------------------- full forward ----------------------------------
def lightning_attention_forward(x, params, slope_rate, past_kv):
    b, n, D = x.shape
    h, d = params["num_heads"], params["head_dim"]
    x2d = x.reshape(b * n, D)

    qkv = qkv_proj_silu(x2d, params["wqkv_t"])                  # (b*n, 3*h*d), SiLU fused
    qkv = qkv.reshape(b, n, 3 * h * d)                          # free reshape (no copy)

    attn, kv_new = lightning_recurrence_blocked(
        qkv, past_kv, slope_rate, h, d, x.dtype)                # (b, n, h*d), (b,h,d,d)

    attn_flat = attn.reshape(b * n, h * d)                      # free reshape
    out = post_proj(attn_flat, x2d, params["norm_w"],
                    params["wgate_t"], params["wout_t"])
    return out.reshape(b, n, D), kv_new


# -------------------------- deterministic parameter init -----------------------
def build_slope_tensor(n_heads):
    def get_slopes(n):
        def power_of_2(n):
            start = 2 ** (-(2 ** -(math.log2(n) - 3)))
            return [start * (start ** i) for i in range(n)]
        if math.log2(n).is_integer():
            return power_of_2(n)
        closest = 2 ** math.floor(math.log2(n))
        return (power_of_2(closest)
                + get_slopes(2 * closest)[0::2][: n - closest])
    return jnp.array(get_slopes(n_heads), dtype=jnp.float32).reshape(n_heads, 1, 1)


def init_params(key, hidden_size, num_heads, head_dim):
    H = num_heads * head_dim
    k1, k2, k3 = jax.random.split(key, 3)
    # torch nn.Linear weights are (out, in); store transposed for x @ W^T
    wqkv = jax.random.normal(k1, (3 * H, hidden_size), jnp.float32) / math.sqrt(hidden_size)
    wgate = jax.random.normal(k2, (H, hidden_size), jnp.float32) / math.sqrt(hidden_size)
    wout = jax.random.normal(k3, (hidden_size, H), jnp.float32) / math.sqrt(H)
    return {
        "num_heads": num_heads,
        "head_dim": head_dim,
        "wqkv_t": wqkv.T,                         # (D, 3H)
        "wgate_t": wgate.T,                       # (D, H)
        "wout_t": wout.T,                         # (H, D)
        "norm_w": jnp.ones((1, H), jnp.float32),  # RMSNorm weight (initialized to ones)
    }


# ------------------------------ pure-JAX reference ------------------------------
def reference_forward(x, params, slope_rate, past_kv, eps=1e-6):
    b, n, D = x.shape
    h, d = params["num_heads"], params["head_dim"]
    qkv = jax.nn.silu(jnp.matmul(x, params["wqkv_t"], precision="highest"))
    qkv = qkv.reshape(b, n, h, 3 * d)
    q, k, v = jnp.split(qkv, 3, axis=-1)
    q = jnp.transpose(q, (0, 2, 1, 3))
    k = jnp.transpose(k, (0, 2, 1, 3))
    v = jnp.transpose(v, (0, 2, 1, 3))
    ratio = jnp.exp(-slope_rate).reshape(1, h, 1, 1)

    def step(kv, idx):
        ki, vi, qi = k[:, :, idx, :], v[:, :, idx, :], q[:, :, idx, :]
        kv = ratio * kv + ki[..., :, None] * vi[..., None, :]
        out = jnp.einsum("bhe,bhed->bhd", qi, kv, precision="highest")
        return kv, out

    kv_final, outs = lax.scan(step, past_kv.astype(jnp.float32), jnp.arange(n))
    attn = jnp.transpose(outs, (1, 2, 0, 3))                     # (b, h, n, d)
    attn_flat = jnp.transpose(attn, (0, 2, 1, 3)).reshape(b, n, h * d)
    var = jnp.mean(attn_flat * attn_flat, axis=-1, keepdims=True)
    normed = params["norm_w"].reshape(-1) * (attn_flat * lax.rsqrt(var + eps))
    gate = jax.nn.sigmoid(jnp.matmul(x, params["wgate_t"], precision="highest"))
    out = jnp.matmul(gate * normed, params["wout_t"], precision="highest")
    return out, kv_final


if __name__ == "__main__":
    batch, seq, hidden = 2, 8, 32
    num_heads, head_dim = 2, 16

    key = jax.random.PRNGKey(0)
    kx, kkv, kp = jax.random.split(key, 3)
    x = jax.random.normal(kx, (batch, seq, hidden), jnp.float32)
    past_kv = jax.random.normal(kkv, (batch, num_heads, head_dim, head_dim), jnp.float32)
    slope_rate = build_slope_tensor(num_heads)                 # (h, 1, 1)
    params = init_params(kp, hidden, num_heads, head_dim)

    out, kv_new = lightning_attention_forward(x, params, slope_rate, past_kv)
    out = jax.block_until_ready(out)
    kv_new = jax.block_until_ready(kv_new)

    ref_out, ref_kv = reference_forward(x, params, slope_rate, past_kv)
    assert out.shape == (batch, seq, hidden)
    assert kv_new.shape == (batch, num_heads, head_dim, head_dim)
    np.testing.assert_allclose(np.asarray(out), np.asarray(ref_out), rtol=1e-2, atol=1e-2)
    np.testing.assert_allclose(np.asarray(kv_new), np.asarray(ref_kv), rtol=1e-2, atol=1e-2)

    print("KERNEL_OK")
</pallas_src>

<mosaic_0001>
module attributes {stable_mosaic.version = 11 : i64} {
  func.func @_matmul_silu_kernel(%arg0: i32, %arg1: i32, %arg2: i32, %arg3: memref<16x32xf32, #tpu.memory_space<vmem>>, %arg4: memref<32x96xf32, #tpu.memory_space<vmem>>, %arg5: memref<16x96xf32, #tpu.memory_space<vmem>>, %arg6: memref<16x96xf32, #tpu.memory_space<vmem>>) attributes {dimension_semantics = [#tpu.dimension_semantics<parallel>, #tpu.dimension_semantics<parallel>, #tpu.dimension_semantics<arbitrary>], iteration_bounds = array<i64: 1, 1, 1>, scalar_prefetch = 0 : i64, scratch_operands = 1 : i64, tpu.core_type = #tpu.core_type<tc>, window_params = [{transform_indices = @transform_0, window_bounds = array<i64: 16, 32>}, {transform_indices = @transform_1, window_bounds = array<i64: 32, 96>}, {transform_indices = @transform_2, window_bounds = array<i64: 16, 96>}]} {
    %c0_i32 = arith.constant 0 : i32
    %0 = arith.cmpi eq, %arg2, %c0_i32 : i32
    %1 = arith.extui %0 : i1 to i32
    %c0_i32_0 = arith.constant 0 : i32
    %2 = arith.cmpi ne, %1, %c0_i32_0 : i32
    scf.if %2 {
      %cst_10 = arith.constant 0.000000e+00 : f32
      %12 = vector.broadcast %cst_10 : f32 to vector<16x96xf32>
      %c0_11 = arith.constant 0 : index
      %c0_12 = arith.constant 0 : index
      %13 = vector.load %arg6[%c0_11, %c0_12] : memref<16x96xf32, #tpu.memory_space<vmem>>, vector<16x96xf32>
      tpu.vector_store %arg6[%c0_11, %c0_12], %12 {strides = array<i32>} : memref<16x96xf32, #tpu.memory_space<vmem>>, vector<16x96xf32>,
    } else {
    }
    %c0 = arith.constant 0 : index
    %c0_1 = arith.constant 0 : index
    %3 = vector.load %arg6[%c0, %c0_1] : memref<16x96xf32, #tpu.memory_space<vmem>>, vector<16x96xf32>
    %c0_2 = arith.constant 0 : index
    %c0_3 = arith.constant 0 : index
    %4 = vector.load %arg3[%c0_2, %c0_3] : memref<16x32xf32, #tpu.memory_space<vmem>>, vector<16x32xf32>
    %c0_4 = arith.constant 0 : index
    %c0_5 = arith.constant 0 : index
    %5 = vector.load %arg4[%c0_4, %c0_5] : memref<32x96xf32, #tpu.memory_space<vmem>>, vector<32x96xf32>
    %cst = arith.constant dense<0.000000e+00> : vector<16x96xf32>
    %6 = tpu.matmul %4, %5, %cst {dimension_numbers = #tpu.dot_dimension_numbers<[1], [0], [0], [1], [0, 0, 1, 1], [], []>} : vector<16x32xf32>, vector<32x96xf32>, vector<16x96xf32> -> vector<16x96xf32>
    %7 = arith.addf %3, %6 : vector<16x96xf32>
    %c0_6 = arith.constant 0 : index
    %c0_7 = arith.constant 0 : index
    %8 = vector.load %arg6[%c0_6, %c0_7] : memref<16x96xf32, #tpu.memory_space<vmem>>, vector<16x96xf32>
    tpu.vector_store %arg6[%c0_6, %c0_7], %7 {strides = array<i32>} : memref<16x96xf32, #tpu.memory_space<vmem>>, vector<16x96xf32>,
    %c0_i32_8 = arith.constant 0 : i32
    %9 = arith.cmpi eq, %arg2, %c0_i32_8 : i32
    %10 = arith.extui %9 : i1 to i32
    %c0_i32_9 = arith.constant 0 : i32
    %11 = arith.cmpi ne, %10, %c0_i32_9 : i32
    scf.if %11 {
      %c0_10 = arith.constant 0 : index
      %c0_11 = arith.constant 0 : index
      %12 = vector.load %arg6[%c0_10, %c0_11] : memref<16x96xf32, #tpu.memory_space<vmem>>, vector<16x96xf32>
      %13 = arith.negf %12 : vector<16x96xf32>
      %14 = math.exp %13 : vector<16x96xf32>
      %cst_12 = arith.constant 1.000000e+00 : f32
      %15 = vector.broadcast %cst_12 : f32 to vector<16x96xf32>
      %16 = arith.addf %15, %14 : vector<16x96xf32>
      %17 = arith.divf %15, %16 : vector<16x96xf32>
      %18 = arith.mulf %12, %17 : vector<16x96xf32>
      %c0_13 = arith.constant 0 : index
      %c0_14 = arith.constant 0 : index
      %19 = vector.load %arg5[%c0_13, %c0_14] : memref<16x96xf32, #tpu.memory_space<vmem>>, vector<16x96xf32>
      tpu.vector_store %arg5[%c0_13, %c0_14], %18 {strides = array<i32>} : memref<16x96xf32, #tpu.memory_space<vmem>>, vector<16x96xf32>,
    } else {
    }
    return
  }
  func.func @transform_0(%arg0: i32, %arg1: i32, %arg2: i32) -> (i32, i32) {
    %c0_i32 = arith.constant 0 : i32
    return %arg0, %arg2 : i32, i32
  }
  func.func @transform_1(%arg0: i32, %arg1: i32, %arg2: i32) -> (i32, i32) {
    %c0_i32 = arith.constant 0 : i32
    return %arg2, %arg1 : i32, i32
  }
  func.func @transform_2(%arg0: i32, %arg1: i32, %arg2: i32) -> (i32, i32) {
    %c0_i32 = arith.constant 0 : i32
    return %arg0, %arg1 : i32, i32
  }
}

</mosaic_0001>

<bundles_post_ra>
// kernel: tpu_custom_call.1
= control target key start
LH: loop header
LB: loop body
LE: loop exit
PB: predicated region body
PF: predicated region fallthrough
CT: control target
= control target key end

     0   :  { %7 = vsyncpa [#allocation4], 0  ;;  %s306_s0 = inlined_call_operand.hbm [shape: f32[16,32], index: 0, kind: input, shape index: {}]   ;;  %s307_s1 = inlined_call_operand.hbm [shape: f32[32,96], index: 1, kind: input, shape index: {}]   ;;  %s308_s2 = inlined_call_operand.hbm [shape: f32[16,96], index: 2, kind: output, shape index: {}]  }
   0x1   :  { %8 = vsyncpa [#allocation7], 0 }
   0x2   :  { %9 = vsyncpa [#allocation5], 0  ;;  %s14_s11 = sshll.u32 %s306_s0, 4  ;;  %s261_s12 = smov [#allocation3]   ;;  %s15_s11 = int_to_ptr.hbm [resolvable:$true] %s14_s11 }
   0x3   :  { %s16_s13 = sshll.u32 %s261_s12, 4  ;;  %s27_s16 = sshll.u32 %s307_s1, 4  ;;  %s17_s13 = int_to_ptr.vmem [resolvable:$true] %s16_s13  ;;  %s28_s16 = int_to_ptr.hbm [resolvable:$true] %s27_s16 }
   0x4   :  { %s262_s17 = smov 128   ;;  %s263_s18 = smov 8  }
   0x5   :  { %22 = dma.hbm_to_vmem [thread:$0]  %s15_s11, 256, %s17_s13, [#allocation4], %s262_s17, %s262_s17, %s263_s18  }
   0x6   :  { %s264_s19 = smov [#allocation6]  }
   0x7   :  { %s29_s20 = sshll.u32 %s264_s19, 4  ;;  %s30_s20 = int_to_ptr.vmem [resolvable:$true] %s29_s20 }
   0x8   :  { %35 = dma.hbm_to_vmem [thread:$0]  %s28_s16, 512, %s30_s20, [#allocation7], %s262_s17, %s262_s17, %s263_s18  }
   0x9   :  { %255 = dma.done.wait [#allocation4], 256  }
   0xa   :  { %256 = vsyncadd [#allocation4], 4294967040 }
   0xb   :  { %257 = dma.done.wait [#allocation7], 512  }
   0xc   :  { %258 = vsyncadd [#allocation7], 4294966784  ;;  %vm48_vm0 = vcmask 785408   ;;  %v265_v0 = vmov 0.0   ;;  %v58_v1 = vld [vmem:[#allocation6 + $0x18] sm:$0xff]  ;;  %v57_v2 = vld [vmem:[#allocation6 + $0x10] sm:$0xff] }
   0xd   :  { %49 = vst.msk [vmem:[#allocation2] sm:$0xff] %vm48_vm0, %v265_v0  ;;  %78 = vmatpush.msra.mxu0 %v58_v1  ;;  %165 = vmatpush.msra.mxu1 %v58_v1  ;;  %v56_v3 = vld [vmem:[#allocation6 + $0x8] sm:$0xff]  ;;  %v55_v4 = vld [vmem:[#allocation6] sm:$0xff]  ;;  %v53_v5 = vld [vmem:[#allocation3] sm:$0xff]  ;;  %vm59_vm1 = vcmask 261120   ;;  %s266_s0 = smov [#allocation8]  }
   0xe   :  { %50 = vst.msk [vmem:[#allocation2 + $0x8] sm:$0xff] %vm48_vm0, %v265_v0  ;;  %v54_v6 = vld [vmem:[#allocation3 + $0x8] sm:$0xff]  ;;  %s145_s1 = sshll.u32 %s266_s0, 4  ;;  %s147_s23 = sshll.u32 %s308_s2, 4  ;;  %s146_s1 = int_to_ptr.vmem [resolvable:$true] %s145_s1  ;;  %s148_s23 = int_to_ptr.hbm [resolvable:$true] %s147_s23 }
   0xf   :  { %79 = vmatpush.msra.mxu0 %v57_v2  ;;  %166 = vmatpush.msra.mxu1 %v57_v2 }
  0x11   :  { %80 = vmatpush.msra.mxu0 %v56_v3  ;;  %167 = vmatpush.msra.mxu1 %v56_v3 }
  0x13   :  { %81 = vmatpush.msra.mxu0 %v55_v4  ;;  %168 = vmatpush.msra.mxu1 %v55_v4 }
  0x14   :  { %161 = vmatmul.msk.f32.vlgmr.msra.gmra.mxu0 %vm59_vm1, %v53_v5  ;;  %162 = vmatmul.msk.f32.vlgmr.msra.gmra.mxu1 %vm59_vm1, %v54_v6  ;;  %v51_v7 = vld [vmem:[#allocation2] sm:$0xff] }
  0x15   :  { %v52_v8 = vld [vmem:[#allocation2 + $0x8] sm:$0xff] }
  0x91   :  { %v83_v9 = vpop.f32.mrf.mxu0  ;;  %v86_v10 = vpop.f32.mrf.mxu1 }
  0x92   :  { %v89_v11 = vadd.f32 %v83_v9, %v51_v7  ;;  %v90_v12 = vadd.f32 %v86_v10, %v52_v8 }
  0x94   :  { %92 = vst.msk [vmem:[#allocation2] sm:$0xff] %vm48_vm0, %v89_v11 }
  0x95   :  { %93 = vst.msk [vmem:[#allocation2 + $0x8] sm:$0xff] %vm48_vm0, %v90_v12 }
  0x9b   :  { %v97_v13 = vld [vmem:[#allocation2] sm:$0xff] }
  0x9c   :  { %v98_v14 = vld [vmem:[#allocation2 + $0x8] sm:$0xff]  ;;  %v163_v15 = vmul.f32 -1.442695, %v97_v13 }
  0x9d   :  { %v164_v16 = vmul.f32 -1.442695, %v98_v14 }
  0x9e   :  { %175 = vpow2.f32 %v163_v15 }
  0x9f   :  { %177 = vpow2.f32 %v164_v16 }
  0xa4   :  { %v176_v17 = vpop.eup %175 }
  0xa5   :  { %v178_v18 = vpop.eup %177  ;;  %v105_v19 = vadd.f32 1.0, %v176_v17 }
  0xa6   :  { %v106_v20 = vadd.f32 1.0, %v178_v18 }
  0xa7   :  { %179 = vrcp.f32 %v105_v19  ;;  %v118_v26 = vand.u32 2147483648, %v105_v19  ;;  %v116_v29 = vand.u32 2147483647, %v105_v19  ;;  %vm112_vm4 = vweird.f32 %v105_v19 }
  0xa8   :  { %181 = vrcp.f32 %v106_v20  ;;  %v133_v30 = vand.u32 2147483648, %v106_v20  ;;  %v131_v32 = vand.u32 2147483647, %v106_v20  ;;  %vm127_vm6 = vweird.f32 %v106_v20 }
  0xa9   :  { %v119_v34 = vor.u32 1.1754944e-38, %v118_v26  ;;  %vm117_vm7 = vcmp.eq.f32.partialorder %v116_v29, 8.507059e+37 }
  0xaa   :  { %v134_v37 = vor.u32 1.1754944e-38, %v133_v30  ;;  %vm132_vm9 = vcmp.eq.f32.partialorder %v131_v32, 8.507059e+37 }
  0xad   :  { %v180_v21 = vpop.eup %179 }
  0xae   :  { %v182_v22 = vpop.eup %181  ;;  %v108_v23 = vmul.f32 %v180_v21, %v105_v19  ;;  %vm113_vm2 = vweird.f32 %v180_v21 }
  0xaf   :  { %v123_v24 = vmul.f32 %v182_v22, %v106_v20  ;;  %vm128_vm3 = vweird.f32 %v182_v22  ;;  %vm114_vm5 = vmor %vm112_vm4, %vm113_vm2 }
  0xb0   :  { %v109_v25 = vsub.f32 1.0, %v108_v23  ;;  %vm129_vm8 = vmor %vm127_vm6, %vm128_vm3 }
  0xb1   :  { %v124_v27 = vsub.f32 1.0, %v123_v24 }
  0xb2   :  { %v110_v28 = vmul.f32 %v180_v21, %v109_v25 }
  0xb3   :  { %v125_v31 = vmul.f32 %v182_v22, %v124_v27 }
  0xb4   :  { %v111_v33 = vadd.f32 %v180_v21, %v110_v28 }
  0xb5   :  { %v126_v35 = vadd.f32 %v182_v22, %v125_v31 }
  0xb6   :  { %v115_v36 = vsel %vm114_vm5, %v180_v21, %v111_v33 }
  0xb7   :  { %v120_v38 = vsel %vm117_vm7, %v119_v34, %v115_v36  ;;  %v130_v39 = vsel %vm129_vm8, %v182_v22, %v126_v35 }
  0xb8   :  { %v135_v40 = vsel %vm132_vm9, %v134_v37, %v130_v39  ;;  %v137_v41 = vmul.f32 %v120_v38, %v97_v13 }
  0xb9   :  { %v138_v42 = vmul.f32 %v135_v40, %v98_v14 }
  0xba   :  { %139 = vst.msk [vmem:[#allocation8] sm:$0xff] %vm48_vm0, %v137_v41 }
  0xbb   :  { %140 = vst.msk [vmem:[#allocation8 + $0x8] sm:$0xff] %vm48_vm0, %v138_v42 }
  0xbc   :  { %153 = dma.vmem_to_hbm [thread:$0]  %s146_s1, 256, %s148_s23, [#allocation5], %s262_s17, %s262_s17, %s263_s18  }
  0xbd   :  { %259 = dma.done.wait [#allocation5], 256  }
  0xbe   :  { %260 = vsyncadd [#allocation5], 4294967040 }
  0xbf   :  { %158 = vsyncpa [#allocation4], 1 }
  0xc0   :  { %159 = vsyncpa [#allocation7], 1 }
  0xc1   :  { %160 = vsyncpa [#allocation5], 1 }

</bundles_post_ra>
